<compile_context>
chip_gen: v7x
topology: tpu7x:2x2x1
jax: 0.10.0
libtpu: 0.0.40
codegen_flags: <defaults>
</compile_context>

<pallas_src>
import functools
from typing import NamedTuple

import jax
import jax.numpy as jnp
from jax.experimental import pallas as pl
from jax.experimental.pallas import tpu as pltpu

_BN_EPS = 1e-5
_LANE = 128
_SUBLANE = 8


def _round_up(x, m):
    return ((x + m - 1) // m) * m


# ----------------------------- kernel ---------------------------------------


def _make_fused_mlp_kernel(n_layers, relu_last):
    """Fused (Linear[+folded BN] -> ReLU)* [-> Linear] kernel.

    x_ref: (TILE_B, Dp)       activation batch tile (pipelined over the grid)
    w_ref: (L, Dp, Dp)        BN-folded, zero-padded weights (VMEM resident)
    b_ref: (L, 1, Dp)         BN-folded, zero-padded biases (f32)
    o_ref: (TILE_B, out_cols) final output tile
    """

    def kernel(x_ref, w_ref, b_ref, o_ref):
        compute_dtype = w_ref.dtype
        h = x_ref[...]
        for l in range(n_layers):                     # static unroll (L small)
            z = jnp.dot(h.astype(compute_dtype), w_ref[l],
                        preferred_element_type=jnp.float32)
            z = z + b_ref[l]                          # f32 epilogue
            if l < n_layers - 1 or relu_last:
                z = jnp.maximum(z, 0.0)
            h = z                                     # stays on-chip
        o_ref[...] = h[:, : o_ref.shape[1]].astype(o_ref.dtype)

    return kernel


# ----------------------------- params ---------------------------------------


class MLPConfig(NamedTuple):
    n_layers: int     # hidden layers + optional output layer
    d_pad: int        # padded feature width (multiple of 128)
    out_dim: int      # true logical output width
    out_cols: int     # columns actually written by the kernel
    relu_last: bool   # True only when there is no output layer
    tile_b: int       # max batch rows per grid step


def init_mlp_params(key, input_dim, embed_dims, output_layer=True,
                    dtype=jnp.float32):
    """Parameters with the same shapes/init ranges as the PyTorch module.
    Linear weights are stored transposed vs torch: w has shape (D_in, D_out)."""
    params = {"hidden": [], "output": None}
    d_in = input_dim
    for d_out in embed_dims:
        key, kw, kb = jax.random.split(key, 3)
        bound = 1.0 / float(d_in) ** 0.5
        params["hidden"].append({
            "w": jax.random.uniform(kw, (d_in, d_out), dtype, -bound, bound),
            "b": jax.random.uniform(kb, (d_out,), dtype, -bound, bound),
            # BatchNorm1d defaults: gamma=1, beta=0, running stats (0, 1)
            "gamma": jnp.ones((d_out,), dtype),
            "beta": jnp.zeros((d_out,), dtype),
            "running_mean": jnp.zeros((d_out,), dtype),
            "running_var": jnp.ones((d_out,), dtype),
        })
        d_in = d_out
    if output_layer:
        key, kw, kb = jax.random.split(key, 3)
        bound = 1.0 / float(d_in) ** 0.5
        params["output"] = {
            "w": jax.random.uniform(kw, (d_in, 1), dtype, -bound, bound),
            "b": jax.random.uniform(kb, (1,), dtype, -bound, bound),
        }
    return params


def _pad2(a, rows, cols):
    return jnp.pad(a, ((0, rows - a.shape[0]), (0, cols - a.shape[1])))


def prepare_params(raw, compute_dtype=jnp.float32, tile_b=256):
    """One-time constant fold: BN(eval) folded into Linear weights/bias,
    feature dims zero-padded to 128 lanes, all layers stacked."""
    hidden, output = raw["hidden"], raw["output"]
    dims = []
    for layer in hidden:
        dims += list(layer["w"].shape)
    if output is not None:
        dims += list(output["w"].shape)
    d_pad = _round_up(max(dims), _LANE)

    ws, bs = [], []
    for layer in hidden:
        w = layer["w"].astype(jnp.float32)
        b = layer["b"].astype(jnp.float32)
        scale = (layer["gamma"].astype(jnp.float32) *
                 jax.lax.rsqrt(layer["running_var"].astype(jnp.float32) + _BN_EPS))
        w_f = w * scale[None, :]
        b_f = ((b - layer["running_mean"].astype(jnp.float32)) * scale
               + layer["beta"].astype(jnp.float32))
        ws.append(_pad2(w_f, d_pad, d_pad))
        bs.append(_pad2(b_f[None, :], 1, d_pad))
    if output is not None:
        ws.append(_pad2(output["w"].astype(jnp.float32), d_pad, d_pad))
        bs.append(_pad2(output["b"].astype(jnp.float32)[None, :], 1, d_pad))

    w_stack = jnp.stack(ws).astype(compute_dtype)   # (L, Dp, Dp)
    b_stack = jnp.stack(bs).astype(jnp.float32)     # (L, 1, Dp) f32 epilogue

    has_output = output is not None
    out_dim = 1 if has_output else hidden[-1]["w"].shape[1]
    cfg = MLPConfig(
        n_layers=len(ws),
        d_pad=d_pad,
        out_dim=out_dim,
        out_cols=1 if has_output else d_pad,  # write (B, 1) directly
        relu_last=not has_output,
        tile_b=tile_b,
    )
    return w_stack, b_stack, cfg


# ----------------------------- forward ---------------------------------------


@functools.partial(jax.jit, static_argnums=(3,))
def mlp_forward(w_stack, b_stack, x, cfg):
    """Eval-mode forward: Dropout is identity; BN already folded into weights."""
    B, d_in = x.shape
    d_pad, n_layers = cfg.d_pad, cfg.n_layers
    tile_b = max(_SUBLANE, min(cfg.tile_b, _round_up(B, _SUBLANE)))
    b_pad = _round_up(B, tile_b)

    # lane-dense, batch-tile-aligned input (zero padding is exact: padded
    # columns hit zero weight rows, padded rows are sliced off afterwards)
    xp = jnp.pad(x.astype(w_stack.dtype),
                 ((0, b_pad - B), (0, d_pad - d_in)))

    flops = 2 * b_pad * n_layers * d_pad * d_pad
    bytes_accessed = (xp.size * xp.dtype.itemsize
                      + w_stack.size * w_stack.dtype.itemsize
                      + b_stack.size * b_stack.dtype.itemsize
                      + b_pad * cfg.out_cols * 4)

    out = pl.pallas_call(
        _make_fused_mlp_kernel(n_layers, cfg.relu_last),
        out_shape=jax.ShapeDtypeStruct((b_pad, cfg.out_cols), jnp.float32),
        grid_spec=pltpu.PrefetchScalarGridSpec(
            num_scalar_prefetch=0,
            grid=(b_pad // tile_b,),
            in_specs=[
                # activation batch tile, auto-pipelined over the grid
                pl.BlockSpec((tile_b, d_pad), lambda i: (i, 0)),
                # weight / bias stacks stay VMEM-resident (constant index_map)
                pl.BlockSpec((n_layers, d_pad, d_pad), lambda i: (0, 0, 0)),
                pl.BlockSpec((n_layers, 1, d_pad), lambda i: (0, 0, 0)),
            ],
            out_specs=pl.BlockSpec((tile_b, cfg.out_cols), lambda i: (i, 0)),
        ),
        compiler_params=pltpu.CompilerParams(
            dimension_semantics=("parallel",),     # megacore batch sharding
            vmem_limit_bytes=32 * 1024 * 1024,     # safe on v7x's 64 MiB VMEM
        ),
        cost_estimate=pl.CostEstimate(
            flops=flops, transcendentals=0, bytes_accessed=bytes_accessed),
    )(xp, w_stack, b_stack)

    return out[:B, :cfg.out_dim]


# ----------------------------- reference -------------------------------------


def mlp_reference(raw, x):
    h = x.astype(jnp.float32)
    for layer in raw["hidden"]:
        z = h @ layer["w"] + layer["b"]
        inv = jax.lax.rsqrt(layer["running_var"] + _BN_EPS)
        z = (z - layer["running_mean"]) * inv * layer["gamma"] + layer["beta"]
        h = jnp.maximum(z, 0.0)
    if raw["output"] is not None:
        h = h @ raw["output"]["w"] + raw["output"]["b"]
    return h


# ----------------------------- main -------------------------------------------


if __name__ == "__main__":
    key = jax.random.PRNGKey(0)
    k_params, k_x, k_big = jax.random.split(key, 3)

    batch, input_dim, embed_dims = 8, 16, [32, 16]
    dropout = 0.2  # identity in eval mode

    raw = init_mlp_params(k_params, input_dim, embed_dims, output_layer=True)
    x = jax.random.normal(k_x, (batch, input_dim), jnp.float32)
    ref = mlp_reference(raw, x)

    # f32 path (matches reference up to BN-fold rounding)
    w_s, b_s, cfg = prepare_params(raw, compute_dtype=jnp.float32)
    out = jax.block_until_ready(mlp_forward(w_s, b_s, x, cfg))
    assert out.shape == (batch, 1), out.shape
    assert jnp.allclose(out, ref, atol=1e-4, rtol=1e-4), (out, ref)

    # larger, ragged batch exercises the batch-tiled / pipelined grid path
    xb = jax.random.normal(k_big, (1000, input_dim), jnp.float32)
    out_b = jax.block_until_ready(mlp_forward(w_s, b_s, xb, cfg))
    refb = mlp_reference(raw, xb)
    assert out_b.shape == (1000, 1), out_b.shape
    assert jnp.allclose(out_b, refb, atol=1e-4, rtol=1e-4)

    # bf16 operands (f32 accumulation / epilogue) for bf16-native MXUs
    w_h, b_h, cfg_h = prepare_params(raw, compute_dtype=jnp.bfloat16)
    out_h = jax.block_until_ready(mlp_forward(w_h, b_h, x, cfg_h))
    assert out_h.shape == (batch, 1), out_h.shape
    assert jnp.allclose(out_h, ref, atol=5e-2, rtol=5e-2), (out_h, ref)

    print("KERNEL_OK")
</pallas_src>

<mosaic_0001>
module attributes {stable_mosaic.version = 11 : i64} {
  func.func @kernel(%arg0: i32, %arg1: memref<8x128xf32, #tpu.memory_space<vmem>>, %arg2: memref<3x128x128xf32, #tpu.memory_space<vmem>>, %arg3: memref<3x1x128xf32, #tpu.memory_space<vmem>>, %arg4: memref<8x1xf32, #tpu.memory_space<vmem>>) attributes {dimension_semantics = [#tpu.dimension_semantics<parallel>], iteration_bounds = array<i64: 1>, scalar_prefetch = 0 : i64, scratch_operands = 0 : i64, tpu.core_type = #tpu.core_type<tc>, window_params = [{transform_indices = @transform_0, window_bounds = array<i64: 8, 128>}, {pipeline_mode = #tpu.pipeline_mode<synchronous>, transform_indices = @transform_1, window_bounds = array<i64: 3, 128, 128>}, {pipeline_mode = #tpu.pipeline_mode<synchronous>, transform_indices = @transform_2, window_bounds = array<i64: 3, 1, 128>}, {transform_indices = @transform_3, window_bounds = array<i64: 8, 1>}]} {
    %c0 = arith.constant 0 : index
    %c0_0 = arith.constant 0 : index
    %0 = vector.load %arg1[%c0, %c0_0] : memref<8x128xf32, #tpu.memory_space<vmem>>, vector<8x128xf32>
    %c0_1 = arith.constant 0 : index
    %c0_2 = arith.constant 0 : index
    %c0_3 = arith.constant 0 : index
    %1 = vector.load %arg2[%c0_1, %c0_2, %c0_3] : memref<3x128x128xf32, #tpu.memory_space<vmem>>, vector<1x128x128xf32>
    %2 = vector.shape_cast %1 : vector<1x128x128xf32> to vector<128x128xf32>
    %cst = arith.constant dense<0.000000e+00> : vector<8x128xf32>
    %3 = tpu.matmul %0, %2, %cst {dimension_numbers = #tpu.dot_dimension_numbers<[1], [0], [0], [1], [0, 0, 1, 1], [], []>} : vector<8x128xf32>, vector<128x128xf32>, vector<8x128xf32> -> vector<8x128xf32>
    %c0_4 = arith.constant 0 : index
    %c0_5 = arith.constant 0 : index
    %c0_6 = arith.constant 0 : index
    %4 = vector.load %arg3[%c0_4, %c0_5, %c0_6] : memref<3x1x128xf32, #tpu.memory_space<vmem>>, vector<1x1x128xf32>
    %5 = vector.shape_cast %4 : vector<1x1x128xf32> to vector<1x128xf32>
    %6 = vector.broadcast %5 : vector<1x128xf32> to vector<8x128xf32>
    %7 = arith.addf %3, %6 : vector<8x128xf32>
    %cst_7 = arith.constant 0.000000e+00 : f32
    %8 = vector.broadcast %cst_7 : f32 to vector<8x128xf32>
    %9 = arith.maximumf %7, %8 : vector<8x128xf32>
    %c1 = arith.constant 1 : index
    %c0_8 = arith.constant 0 : index
    %c0_9 = arith.constant 0 : index
    %10 = vector.load %arg2[%c1, %c0_8, %c0_9] : memref<3x128x128xf32, #tpu.memory_space<vmem>>, vector<1x128x128xf32>
    %11 = vector.shape_cast %10 : vector<1x128x128xf32> to vector<128x128xf32>
    %cst_10 = arith.constant dense<0.000000e+00> : vector<8x128xf32>
    %12 = tpu.matmul %9, %11, %cst_10 {dimension_numbers = #tpu.dot_dimension_numbers<[1], [0], [0], [1], [0, 0, 1, 1], [], []>} : vector<8x128xf32>, vector<128x128xf32>, vector<8x128xf32> -> vector<8x128xf32>
    %c1_11 = arith.constant 1 : index
    %c0_12 = arith.constant 0 : index
    %c0_13 = arith.constant 0 : index
    %13 = vector.load %arg3[%c1_11, %c0_12, %c0_13] : memref<3x1x128xf32, #tpu.memory_space<vmem>>, vector<1x1x128xf32>
    %14 = vector.shape_cast %13 : vector<1x1x128xf32> to vector<1x128xf32>
    %15 = vector.broadcast %14 : vector<1x128xf32> to vector<8x128xf32>
    %16 = arith.addf %12, %15 : vector<8x128xf32>
    %cst_14 = arith.constant 0.000000e+00 : f32
    %17 = vector.broadcast %cst_14 : f32 to vector<8x128xf32>
    %18 = arith.maximumf %16, %17 : vector<8x128xf32>
    %c2 = arith.constant 2 : index
    %c0_15 = arith.constant 0 : index
    %c0_16 = arith.constant 0 : index
    %19 = vector.load %arg2[%c2, %c0_15, %c0_16] : memref<3x128x128xf32, #tpu.memory_space<vmem>>, vector<1x128x128xf32>
    %20 = vector.shape_cast %19 : vector<1x128x128xf32> to vector<128x128xf32>
    %cst_17 = arith.constant dense<0.000000e+00> : vector<8x128xf32>
    %21 = tpu.matmul %18, %20, %cst_17 {dimension_numbers = #tpu.dot_dimension_numbers<[1], [0], [0], [1], [0, 0, 1, 1], [], []>} : vector<8x128xf32>, vector<128x128xf32>, vector<8x128xf32> -> vector<8x128xf32>
    %c2_18 = arith.constant 2 : index
    %c0_19 = arith.constant 0 : index
    %c0_20 = arith.constant 0 : index
    %22 = vector.load %arg3[%c2_18, %c0_19, %c0_20] : memref<3x1x128xf32, #tpu.memory_space<vmem>>, vector<1x1x128xf32>
    %23 = vector.shape_cast %22 : vector<1x1x128xf32> to vector<1x128xf32>
    %24 = vector.broadcast %23 : vector<1x128xf32> to vector<8x128xf32>
    %25 = arith.addf %21, %24 : vector<8x128xf32>
    %26 = vector.extract_strided_slice %25 {offsets = [0, 0], sizes = [8, 1], strides = [1, 1]} : vector<8x128xf32> to vector<8x1xf32>
    %c0_21 = arith.constant 0 : index
    %c0_22 = arith.constant 0 : index
    %27 = vector.load %arg4[%c0_21, %c0_22] : memref<8x1xf32, #tpu.memory_space<vmem>>, vector<8x1xf32>
    tpu.vector_store %arg4[%c0_21, %c0_22], %26 {strides = array<i32>} : memref<8x1xf32, #tpu.memory_space<vmem>>, vector<8x1xf32>,
    return
  }
  func.func @transform_0(%arg0: i32) -> (i32, i32) {
    %c0_i32 = arith.constant 0 : i32
    %c0_i32_0 = arith.constant 0 : i32
    return %arg0, %c0_i32 : i32, i32
  }
  func.func @transform_1(%arg0: i32) -> (i32, i32, i32) {
    %c0_i32 = arith.constant 0 : i32
    %c0_i32_0 = arith.constant 0 : i32
    %c0_i32_1 = arith.constant 0 : i32
    %c0_i32_2 = arith.constant 0 : i32
    return %c0_i32, %c0_i32_0, %c0_i32_1 : i32, i32, i32
  }
  func.func @transform_2(%arg0: i32) -> (i32, i32, i32) {
    %c0_i32 = arith.constant 0 : i32
    %c0_i32_0 = arith.constant 0 : i32
    %c0_i32_1 = arith.constant 0 : i32
    %c0_i32_2 = arith.constant 0 : i32
    return %c0_i32, %c0_i32_0, %c0_i32_1 : i32, i32, i32
  }
  func.func @transform_3(%arg0: i32) -> (i32, i32) {
    %c0_i32 = arith.constant 0 : i32
    %c0_i32_0 = arith.constant 0 : i32
    return %arg0, %c0_i32 : i32, i32
  }
}

</mosaic_0001>

<bundles_post_ra>
// kernel: mlp_forward.1
= control target key start
LH: loop header
LB: loop body
LE: loop exit
PB: predicated region body
PF: predicated region fallthrough
CT: control target
= control target key end

     0   :  { %8 = vsyncpa [#allocation3], 0  ;;  %s584_s12 = smov [#allocation2]   ;;  %s667_s0 = inlined_call_operand.vmem [shape: f32[8,128], index: 0, kind: input, shape index: {}]   ;;  %s668_s1 = inlined_call_operand.hbm [shape: f32[3,128,128], index: 1, kind: input, shape index: {}]   ;;  %s669_s2 = inlined_call_operand.vmem [shape: f32[3,1,128], index: 2, kind: input, shape index: {}]   ;;  %s670_s3 = inlined_call_operand.vmem [shape: f32[8,1], index: 3, kind: output, shape index: {}]  }
   0x1   :  { %s16_s13 = sshll.u32 %s584_s12, 4  ;;  %s560_s16 = scalar_lea.hbm %s668_s1, 6144  ;;  %s17_s13 = int_to_ptr.vmem [resolvable:$true] %s16_s13 }
   0x2   :  { %p561_p0 = scmp.ne.s32.totalorder %s668_s1, %s560_s16  ;;  %p564_p1 = scmp.lt.u32.totalorder %s560_s16, %s668_s1 }
   0x4   :  { %p566_p2 = pnand %p564_p1, %p561_p0 }
   0x6   :  { %569 = shalt.err (!%p566_p2)
}
   0x7   :  { %s570_s21 = scalar_lea.vmem %s17_s13, 6144  ;;  %p575_p4 = scmp.lt.s32.totalorder %s17_s13, %s17_s13 }
   0x8   :  { %p571_p3 = scmp.ne.s32.totalorder %s17_s13, %s570_s21  ;;  %p576_p5 = scmp.lt.s32.totalorder %s570_s21, %s570_s21 }
   0xa   :  { %p577_p6 = por %p576_p5, %p575_p4 }
   0xc   :  { %p578_p7 = pnand %p577_p6, %p571_p3 }
   0xe   :  { %581 = shalt.err (!%p578_p7)
}
   0xf   :  { %s585_s22 = smov 128   ;;  %s586_s23 = smov 8  }
  0x10   :  { %22 = dma.hbm_to_vmem [thread:$0]  %s668_s1, 6144, %s17_s13, [#allocation3], %s585_s22, %s585_s22, %s586_s23  }
  0x11   :  { %582 = dma.done.wait [#allocation3], 6144  }
  0x12   :  { %583 = vsyncadd [#allocation3], 4294961152  ;;  %v587_v0 = vmov 0.0|0.0   ;;  %vm588_vm0 = vmmov 0   ;;  %v589_v1 = vmov 0.0   ;;  %v29_v2 = vld [vmem:[#allocation2] sm:$0xff] }
  0x13   :  { %482 = vmatprep.subr.bf16.mxu0 %v587_v0  ;;  %409 = vmatprep.mubr.msk.f32.mxu0 %vm588_vm0, %v589_v1  ;;  %v30_v3 = vld [vmem:[#allocation2 + $0x8] sm:$0xff]  ;;  %v31_v4 = vld [vmem:[#allocation2 + $0x10] sm:$0xff]  ;;  %v32_v6 = vld [vmem:[#allocation2 + $0x18] sm:$0xff]  ;;  %vm314_vm1 = vcmask 7168  }
  0x14   :  { %506 = vmatprep.subr.bf16.mxu1 %v587_v0  ;;  %444 = vmatprep.mubr.msk.f32.mxu1 %vm588_vm0, %v589_v1  ;;  %v483_v5 = vpack.c.bf16 %v30_v3, %v29_v2  ;;  %v486_v7 = vpack.c.bf16 %v32_v6, %v31_v4  ;;  %v33_v8 = vld [vmem:[#allocation2 + $0x20] sm:$0xff]  ;;  %v34_v9 = vld [vmem:[#allocation2 + $0x28] sm:$0xff]  ;;  %v126_v12 = vld [vmem:[#allocation2 + $0x90] sm:$0xff] }
  0x15   :  { %v124_v10 = vld [vmem:[#allocation2 + $0x80] sm:$0xff]  ;;  %v125_v11 = vld [vmem:[#allocation2 + $0x88] sm:$0xff]  ;;  %v127_v13 = vld [vmem:[#allocation2 + $0x98] sm:$0xff]  ;;  %v489_v14 = vpack.c.bf16 %v34_v9, %v33_v8 }
  0x16   :  { %484 = vmatpush3.bf16.msra.mxu0 %v483_v5  ;;  %v507_v15 = vpack.c.bf16 %v125_v11, %v124_v10  ;;  %v35_v16 = vld [vmem:[#allocation2 + $0x30] sm:$0xff]  ;;  %v36_v17 = vld [vmem:[#allocation2 + $0x38] sm:$0xff]  ;;  %v510_v18 = vpack.c.bf16 %v127_v13, %v126_v12  ;;  %v128_v19 = vld [vmem:[#allocation2 + $0xa0] sm:$0xff] }
  0x17   :  { %485 = vmatprep.subr.bf16.mxu0 %v587_v0  ;;  %v129_v20 = vld [vmem:[#allocation2 + $0xa8] sm:$0xff]  ;;  %v492_v21 = vpack.c.bf16 %v36_v17, %v35_v16  ;;  %v37_v22 = vld [vmem:[#allocation2 + $0x40] sm:$0xff]  ;;  %v130_v25 = vld [vmem:[#allocation2 + $0xb0] sm:$0xff] }
  0x18   :  { %508 = vmatpush3.bf16.msra.mxu1 %v507_v15  ;;  %v38_v23 = vld [vmem:[#allocation2 + $0x48] sm:$0xff]  ;;  %v513_v24 = vpack.c.bf16 %v129_v20, %v128_v19  ;;  %v131_v26 = vld [vmem:[#allocation2 + $0xb8] sm:$0xff]  ;;  %v39_v28 = vld [vmem:[#allocation2 + $0x50] sm:$0xff] }
  0x19   :  { %509 = vmatprep.subr.bf16.mxu1 %v587_v0  ;;  %v495_v27 = vpack.c.bf16 %v38_v23, %v37_v22  ;;  %v40_v29 = vld [vmem:[#allocation2 + $0x58] sm:$0xff]  ;;  %v516_v30 = vpack.c.bf16 %v131_v26, %v130_v25  ;;  %v132_v31 = vld [vmem:[#allocation2 + $0xc0] sm:$0xff]  ;;  %v133_v32 = vld [vmem:[#allocation2 + $0xc8] sm:$0xff] }
  0x1a   :  { %487 = vmatpush3.bf16.msra.mxu0 %v486_v7  ;;  %v498_v33 = vpack.c.bf16 %v40_v29, %v39_v28  ;;  %v41_v34 = vld [vmem:[#allocation2 + $0x60] sm:$0xff]  ;;  %v42_v35 = vld [vmem:[#allocation2 + $0x68] sm:$0xff]  ;;  %v519_v36 = vpack.c.bf16 %v133_v32, %v132_v31  ;;  %v134_v37 = vld [vmem:[#allocation2 + $0xd0] sm:$0xff] }
  0x1b   :  { %488 = vmatprep.subr.bf16.mxu0 %v587_v0  ;;  %v135_v38 = vld [vmem:[#allocation2 + $0xd8] sm:$0xff]  ;;  %v501_v39 = vpack.c.bf16 %v42_v35, %v41_v34  ;;  %v43_v40 = vld [vmem:[#allocation2 + $0x70] sm:$0xff]  ;;  %v136_v43 = vld [vmem:[#allocation2 + $0xe0] sm:$0xff] }
  0x1c   :  { %511 = vmatpush3.bf16.msra.mxu1 %v510_v18  ;;  %v44_v41 = vld [vmem:[#allocation2 + $0x78] sm:$0xff]  ;;  %v522_v42 = vpack.c.bf16 %v135_v38, %v134_v37  ;;  %v137_v44 = vld [vmem:[#allocation2 + $0xe8] sm:$0xff]  ;;  %v28_v47 = vld [vmem:[%s667_s0] sm:$0xff] }
  0x1d   :  { %512 = vmatprep.subr.bf16.mxu1 %v587_v0  ;;  %v504_v45 = vpack.c.bf16 %v44_v41, %v43_v40  ;;  %v525_v46 = vpack.c.bf16 %v137_v44, %v136_v43  ;;  %v138_v48 = vld [vmem:[#allocation2 + $0xf0] sm:$0xff]  ;;  %v139_v49 = vld [vmem:[#allocation2 + $0xf8] sm:$0xff]  ;;  %v220_v51 = vld [vmem:[#allocation2 + $0x100] sm:$0xff] }
  0x1e   :  { %490 = vmatpush3.bf16.msra.mxu0 %v489_v14  ;;  %v528_v50 = vpack.c.bf16 %v139_v49, %v138_v48  ;;  %v221_v52 = vld [vmem:[#allocation2 + $0x108] sm:$0xff]  ;;  %v222_v53 = vld [vmem:[#allocation2 + $0x110] sm:$0xff]  ;;  %v223_v55 = vld [vmem:[#allocation2 + $0x118] sm:$0xff] }
  0x1f   :  { %491 = vmatprep.subr.bf16.mxu0 %v587_v0  ;;  %v531_v54 = vpack.c.bf16 %v221_v52, %v220_v51  ;;  %v534_v56 = vpack.c.bf16 %v223_v55, %v222_v53  ;;  %v224_v57 = vld [vmem:[#allocation2 + $0x120] sm:$0xff]  ;;  %v225_v58 = vld [vmem:[#allocation2 + $0x128] sm:$0xff]  ;;  %v226_v60 = vld [vmem:[#allocation2 + $0x130] sm:$0xff] }
  0x20   :  { %514 = vmatpush3.bf16.msra.mxu1 %v513_v24  ;;  %v537_v59 = vpack.c.bf16 %v225_v58, %v224_v57  ;;  %v227_v61 = vld [vmem:[#allocation2 + $0x138] sm:$0xff]  ;;  %v228_v63 = vld [vmem:[#allocation2 + $0x140] sm:$0xff]  ;;  %v230_v3 = vld [vmem:[#allocation2 + $0x150] sm:$0xff] }
  0x21   :  { %515 = vmatprep.subr.bf16.mxu1 %v587_v0  ;;  %v540_v62 = vpack.c.bf16 %v227_v61, %v226_v60  ;;  %v231_v4 = vld [vmem:[#allocation2 + $0x158] sm:$0xff]  ;;  %v232_v6 = vld [vmem:[#allocation2 + $0x160] sm:$0xff]  ;;  %v233_v7 = vld [vmem:[#allocation2 + $0x168] sm:$0xff] }
  0x22   :  { %493 = vmatpush3.bf16.msra.mxu0 %v492_v21  ;;  %v546_v5 = vpack.c.bf16 %v231_v4, %v230_v3  ;;  %v549_v8 = vpack.c.bf16 %v233_v7, %v232_v6  ;;  %v321_v9 = vld [vmem:[%s669_s2] ss:$0 sm:$0xff]  ;;  %v234_v14 = vld [vmem:[#allocation2 + $0x170] sm:$0xff]  ;;  %v235_v15 = vld [vmem:[#allocation2 + $0x178] sm:$0xff] }
  0x23   :  { %494 = vmatprep.subr.bf16.mxu0 %v587_v0  ;;  %v552_v16 = vpack.c.bf16 %v235_v15, %v234_v14  ;;  %v323_v17 = vld [vmem:[%s669_s2 + $0x1] ss:$0 sm:$0xff]  ;;  %v325_v21 = vld [vmem:[%s669_s2 + $0x2] ss:$0 sm:$0xff] }
  0x24   :  { %517 = vmatpush3.bf16.msra.mxu1 %v516_v30 }
  0x25   :  { %518 = vmatprep.subr.bf16.mxu1 %v587_v0 }
  0x26   :  { %496 = vmatpush3.bf16.msra.mxu0 %v495_v27 }
  0x27   :  { %497 = vmatprep.subr.bf16.mxu0 %v587_v0 }
  0x28   :  { %520 = vmatpush3.bf16.msra.mxu1 %v519_v36 }
  0x29   :  { %521 = vmatprep.subr.bf16.mxu1 %v587_v0 }
  0x2a   :  { %499 = vmatpush3.bf16.msra.mxu0 %v498_v33 }
  0x2b   :  { %500 = vmatprep.subr.bf16.mxu0 %v587_v0 }
  0x2c   :  { %523 = vmatpush3.bf16.msra.mxu1 %v522_v42 }
  0x2d   :  { %524 = vmatprep.subr.bf16.mxu1 %v587_v0 }
  0x2e   :  { %502 = vmatpush3.bf16.msra.mxu0 %v501_v39 }
  0x2f   :  { %503 = vmatprep.subr.bf16.mxu0 %v587_v0 }
  0x30   :  { %526 = vmatpush3.bf16.msra.mxu1 %v525_v46 }
  0x31   :  { %527 = vmatprep.subr.bf16.mxu1 %v587_v0 }
  0x32   :  { %505 = vmatpush3.bf16.msra.mxu0 %v504_v45 }
  0x33   :  { %530 = vmatprep.subr.bf16.mxu0 %v587_v0 }
  0x34   :  { %529 = vmatpush3.bf16.msra.mxu1 %v528_v50 }
  0x35   :  { %410 = vmatmul.mubr.f32.vlgmr.msra.gmra.mrb[0].mxu0 %v28_v47 }
  0x36   :  { %479 = vmatprep.mubr.msk.f32.mxu0 %vm588_vm0, %v589_v1  ;;  %532 = vmatpush3.bf16.msra.mxu0 %v531_v54  ;;  %v229_v1 = vld [vmem:[#allocation2 + $0x148] sm:$0xff] }
  0x37   :  { %533 = vmatprep.subr.bf16.mxu0 %v587_v0  ;;  %v543_v2 = vpack.c.bf16 %v229_v1, %v228_v63 }
  0x3a   :  { %535 = vmatpush3.bf16.msra.mxu0 %v534_v56 }
  0x3b   :  { %536 = vmatprep.subr.bf16.mxu0 %v587_v0 }
  0x3e   :  { %538 = vmatpush3.bf16.msra.mxu0 %v537_v59 }
  0x3f   :  { %539 = vmatprep.subr.bf16.mxu0 %v587_v0 }
  0x42   :  { %541 = vmatpush3.bf16.msra.mxu0 %v540_v62 }
  0x43   :  { %542 = vmatprep.subr.bf16.mxu0 %v587_v0 }
  0x46   :  { %544 = vmatpush3.bf16.msra.mxu0 %v543_v2 }
  0x47   :  { %545 = vmatprep.subr.bf16.mxu0 %v587_v0 }
  0x4a   :  { %547 = vmatpush3.bf16.msra.mxu0 %v546_v5 }
  0x4b   :  { %548 = vmatprep.subr.bf16.mxu0 %v587_v0 }
  0x4e   :  { %550 = vmatpush3.bf16.msra.mxu0 %v549_v8 }
  0x4f   :  { %551 = vmatprep.subr.bf16.mxu0 %v587_v0 }
  0x52   :  { %553 = vmatpush3.bf16.msra.mxu0 %v552_v16 }
 0x108   :  { %v118_v10 = vpop.f32.mrb[0].mxu0 }
 0x109   :  { %v119_v11 = vadd.f32 %v321_v9, %v118_v10  ;;  %v411_v12 = vpop.f32.mrb[1].mxu0 }
 0x10b   :  { %v122_v13 = vmax.f32 %v119_v11, 0.0 }
 0x10d   :  { %445 = vmatmul.mubr.f32.vlgmr.msra.gmra.mrb[0].mxu1 %v122_v13 }
 0x1e0   :  { %v214_v18 = vpop.f32.mrb[0].mxu1 }
 0x1e1   :  { %v215_v19 = vadd.f32 %v323_v17, %v214_v18  ;;  %v446_v0 = vpop.f32.mrb[1].mxu1 }
 0x1e3   :  { %v218_v20 = vmax.f32 %v215_v19, 0.0 }
 0x1e5   :  { %480 = vmatmul.mubr.f32.vlgmr.msra.gmra.mrb[2].mxu0 %v218_v20 }
 0x2b8   :  { %v310_v22 = vpop.f32.mrb[2].mxu0 }
 0x2b9   :  { %v311_v23 = vadd.f32 %v325_v21, %v310_v22  ;;  %v481_v24 = vpop.f32.mrb[3].mxu0 }
 0x2bb   :  { %315 = vst.msk [vmem:[%s670_s3] sm:$0xff] %vm314_vm1, %v311_v23 }
 0x2bc   :  { %320 = vsyncpa [#allocation3], 1 }

</bundles_post_ra>
